<compile_context>
chip_gen: v7x
topology: tpu7x:2x2x1
jax: 0.10.0
libtpu: 0.0.40
codegen_flags: <defaults>
</compile_context>

<pallas_src>
import functools

import jax
import jax.numpy as jnp
import numpy as np
from jax.experimental import pallas as pl
from jax.experimental.pallas import tpu as pltpu

_EPS = 1e-5


# ----------------------------------------------------------------------------
# Fused kernel: streamed global average pool + fc + BN(train) + ReLU + heads
# ----------------------------------------------------------------------------
def _attention3d_kernel(x_ref, wfc_ref, gamma_ref, beta_ref, wh_ref, bh_ref,
                        out_ref, acc_ref, *, chunk, spatial, n_sig, eps,
                        mask_last):
    c = pl.program_id(0)

    @pl.when(c == 0)
    def _init():
        acc_ref[...] = jnp.zeros_like(acc_ref)

    # ---- streaming partial sums over the lane-dense spatial axis -----------
    xb = x_ref[...].astype(jnp.float32)                     # (N, C, chunk)
    if mask_last:  # compile-time: only emitted when S % chunk != 0
        lane = jax.lax.broadcasted_iota(jnp.int32, xb.shape, 2)
        xb = jnp.where(lane < spatial - c * chunk, xb, 0.0)
    acc_ref[...] += jnp.sum(xb, axis=-1)                    # (N, C)

    # ---- finalize: everything downstream of the pool is tiny ---------------
    @pl.when(c == pl.num_programs(0) - 1)
    def _finalize():
        pooled = acc_ref[...] * (1.0 / spatial)             # (N, C)

        # fc (1x1x1 conv, no bias)
        y = jnp.dot(pooled, wfc_ref[...],
                    preferred_element_type=jnp.float32)     # (N, A)

        # BatchNorm3d, training mode: biased batch statistics over N
        mean = jnp.mean(y, axis=0, keepdims=True)
        var = jnp.mean(jnp.square(y - mean), axis=0, keepdims=True)
        y = (y - mean) * jax.lax.rsqrt(var + eps) * gamma_ref[...] + beta_ref[...]
        y = jnp.maximum(y, 0.0)                             # ReLU

        # all four heads as ONE matmul (1/T already folded into wh/bh)
        z = jnp.dot(y, wh_ref[...],
                    preferred_element_type=jnp.float32) + bh_ref[...]  # (N, T)

        # columns [0, n_sig) -> sigmoid heads; [n_sig, T) -> softmax (kernel)
        col = jax.lax.broadcasted_iota(jnp.int32, z.shape, 1)
        is_k = col >= n_sig
        zk = jnp.where(is_k, z, -jnp.inf)
        e = jnp.exp(zk - jnp.max(zk, axis=-1, keepdims=True))
        denom = jnp.sum(e, axis=-1, keepdims=True)
        out_ref[...] = jnp.where(is_k,
                                 e * pl.reciprocal(denom, approx=True),
                                 jax.nn.sigmoid(z))


# ----------------------------------------------------------------------------
# Forward pass (matches Attention3d.forward)
# ----------------------------------------------------------------------------
def attention3d_forward(x, params, *, kernel_size, kernel_num, temperature=1.0,
                        target_chunk_bytes=8 << 20, eps=_EPS):
    N, C, D, H, W = x.shape
    S = D * H * W
    x2 = x.reshape(N, C, S)                     # metadata-only reshape

    A = params["w_fc"].shape[1]
    c_in = params["w_channel"].shape[1]
    c_out = params["w_filter"].shape[1]
    k3 = params["w_spatial"].shape[1]
    knum = params["w_kernel"].shape[1]
    assert k3 == kernel_size ** 3 and knum == kernel_num
    n_sig = c_in + c_out + k3
    T = n_sig + knum

    # fold 1/temperature into the (tiny) concatenated head weights/biases
    inv_t = 1.0 / float(temperature)
    w_heads = jnp.concatenate([params["w_channel"], params["w_filter"],
                               params["w_spatial"], params["w_kernel"]],
                              axis=1) * inv_t                       # (A, T)
    b_heads = (jnp.concatenate([params["b_channel"], params["b_filter"],
                                params["b_spatial"], params["b_kernel"]])
               * inv_t).reshape(1, T)

    # chunk sizing: lane-dense multiple of 128, ~target_chunk_bytes of
    # (sublane-padded) VMEM per buffer; full extent if the volume already fits.
    c_pad = -(-C // 8) * 8
    bytes_per_lane = N * c_pad * x.dtype.itemsize
    max_lanes = max(128, (target_chunk_bytes // bytes_per_lane) // 128 * 128)
    chunk = S if S <= max_lanes else max_lanes
    n_chunks = pl.cdiv(S, chunk)
    mask_last = (S % chunk) != 0

    kernel = functools.partial(_attention3d_kernel, chunk=chunk, spatial=S,
                               n_sig=n_sig, eps=eps, mask_last=mask_last)

    def const2d(shape):
        return pl.BlockSpec(shape, lambda c: (0, 0))

    out = pl.pallas_call(
        kernel,
        out_shape=jax.ShapeDtypeStruct((N, T), jnp.float32),
        grid=(n_chunks,),
        in_specs=[
            pl.BlockSpec((N, C, chunk), lambda c: (0, 0, c)),   # streamed x
            const2d((C, A)),                                    # w_fc
            const2d((1, A)),                                    # gamma
            const2d((1, A)),                                    # beta
            const2d((A, T)),                                    # concat head W
            const2d((1, T)),                                    # concat head b
        ],
        out_specs=pl.BlockSpec((N, T), lambda c: (0, 0)),
        scratch_shapes=[pltpu.VMEM((N, C), jnp.float32)],
        compiler_params=pltpu.CompilerParams(
            dimension_semantics=("arbitrary",),
            vmem_limit_bytes=48 * 1024 * 1024),
    )(x2, params["w_fc"], params["gamma"].reshape(1, A),
      params["beta"].reshape(1, A), w_heads, b_heads)

    channel_att = out[:, :c_in].reshape(N, c_in, 1, 1, 1)
    filter_att = out[:, c_in:c_in + c_out].reshape(N, c_out, 1, 1, 1)
    spatial_att = out[:, c_in + c_out:n_sig].reshape(
        N, 1, 1, 1, kernel_size, kernel_size, kernel_size)
    kernel_att = out[:, n_sig:].reshape(N, knum, 1, 1, 1, 1, 1)
    return channel_att, filter_att, spatial_att, kernel_att


# ----------------------------------------------------------------------------
# Deterministic parameter init (mimics the module's _initialize_weights)
# ----------------------------------------------------------------------------
def init_attention3d_params(key, in_planes, out_planes, kernel_size,
                            reduction=0.0625, kernel_num=4, min_channel=16):
    A = max(int(in_planes * reduction), min_channel)
    k3 = kernel_size ** 3

    def conv1x1(k, cin, cout):
        # kaiming_normal_(mode='fan_out', relu): std = sqrt(2 / fan_out),
        # fan_out = cout for a 1x1x1 conv.  Stored as (cin, cout) for matmul.
        std = float(np.sqrt(2.0 / cout))
        return std * jax.random.normal(k, (cin, cout), jnp.float32)

    ks = jax.random.split(key, 5)
    return dict(
        w_fc=conv1x1(ks[0], in_planes, A),
        gamma=jnp.ones((A,), jnp.float32),          # BatchNorm3d weight
        beta=jnp.zeros((A,), jnp.float32),          # BatchNorm3d bias
        w_channel=conv1x1(ks[1], A, in_planes),
        b_channel=jnp.zeros((in_planes,), jnp.float32),
        w_filter=conv1x1(ks[2], A, out_planes),
        b_filter=jnp.zeros((out_planes,), jnp.float32),
        w_spatial=conv1x1(ks[3], A, k3),
        b_spatial=jnp.zeros((k3,), jnp.float32),
        w_kernel=conv1x1(ks[4], A, kernel_num),
        b_kernel=jnp.zeros((kernel_num,), jnp.float32),
    )


# ----------------------------------------------------------------------------
# Pure-JAX reference (numerical sanity check)
# ----------------------------------------------------------------------------
def attention3d_ref(x, params, *, kernel_size, kernel_num, temperature=1.0):
    N = x.shape[0]
    pooled = jnp.mean(x, axis=(2, 3, 4))                         # (N, Cin)
    y = pooled @ params["w_fc"]
    mean = jnp.mean(y, axis=0, keepdims=True)
    var = jnp.mean(jnp.square(y - mean), axis=0, keepdims=True)
    y = (y - mean) / jnp.sqrt(var + _EPS) * params["gamma"] + params["beta"]
    y = jnp.maximum(y, 0.0)
    t = temperature
    ch = jax.nn.sigmoid((y @ params["w_channel"] + params["b_channel"]) / t)
    fi = jax.nn.sigmoid((y @ params["w_filter"] + params["b_filter"]) / t)
    sp = jax.nn.sigmoid((y @ params["w_spatial"] + params["b_spatial"]) / t)
    ke = jax.nn.softmax((y @ params["w_kernel"] + params["b_kernel"]) / t, axis=1)
    return (ch.reshape(N, -1, 1, 1, 1),
            fi.reshape(N, -1, 1, 1, 1),
            sp.reshape(N, 1, 1, 1, kernel_size, kernel_size, kernel_size),
            ke.reshape(N, -1, 1, 1, 1, 1, 1))


# ----------------------------------------------------------------------------
if __name__ == "__main__":
    # Attention3d(in_planes=4, out_planes=8, kernel_size=3, groups=1,
    #             kernel_num=4)  ->  attention_channel = 16, all heads active.
    in_planes, out_planes, kernel_size, kernel_num = 4, 8, 3, 4

    key = jax.random.PRNGKey(0)
    kx1, kx2, kp = jax.random.split(key, 3)
    params = init_attention3d_params(kp, in_planes, out_planes, kernel_size,
                                     kernel_num=kernel_num)

    def check(shape, target_chunk_bytes):
        # per-(sample, channel) offsets keep N=2 batch statistics well separated
        x = (jax.random.normal(kx1, shape, jnp.float32)
             + jax.random.normal(kx2, shape[:2] + (1, 1, 1), jnp.float32))
        fwd = jax.jit(functools.partial(
            attention3d_forward, kernel_size=kernel_size,
            kernel_num=kernel_num, temperature=1.0,
            target_chunk_bytes=target_chunk_bytes))
        outs = jax.block_until_ready(fwd(x, params))
        refs = jax.jit(functools.partial(
            attention3d_ref, kernel_size=kernel_size,
            kernel_num=kernel_num, temperature=1.0))(x, params)
        N = shape[0]
        expected = [(N, in_planes, 1, 1, 1),
                    (N, out_planes, 1, 1, 1),
                    (N, 1, 1, 1, kernel_size, kernel_size, kernel_size),
                    (N, kernel_num, 1, 1, 1, 1, 1)]
        for o, r, es in zip(outs, refs, expected):
            assert o.shape == es, (o.shape, es)
            assert bool(jnp.all(jnp.isfinite(o)))
            np.testing.assert_allclose(np.asarray(o), np.asarray(r),
                                       atol=5e-3, rtol=5e-3)

    # Main config: S = 16^3 = 4096 fits one chunk -> a single grid step.
    check((2, in_planes, 16, 16, 16), 8 << 20)
    # Awkward volume: S = 210 (not a multiple of 128) + tiny chunk budget ->
    # cdiv grid with a masked final partial chunk (exercises the streaming path).
    check((2, in_planes, 5, 6, 7), 1 << 12)

    print("KERNEL_OK")
</pallas_src>

<mosaic_0001>
module attributes {stable_mosaic.version = 11 : i64} {
  func.func @_attention3d_kernel(%arg0: i32, %arg1: memref<2x4x4096xf32, #tpu.memory_space<vmem>>, %arg2: memref<4x16xf32, #tpu.memory_space<vmem>>, %arg3: memref<1x16xf32, #tpu.memory_space<vmem>>, %arg4: memref<1x16xf32, #tpu.memory_space<vmem>>, %arg5: memref<16x43xf32, #tpu.memory_space<vmem>>, %arg6: memref<1x43xf32, #tpu.memory_space<vmem>>, %arg7: memref<2x43xf32, #tpu.memory_space<vmem>>, %arg8: memref<2x4xf32, #tpu.memory_space<vmem>>) attributes {dimension_semantics = [#tpu.dimension_semantics<arbitrary>], iteration_bounds = array<i64: 1>, scalar_prefetch = 0 : i64, scratch_operands = 1 : i64, tpu.core_type = #tpu.core_type<tc>, window_params = [{transform_indices = @transform_0, window_bounds = array<i64: 2, 4, 4096>}, {pipeline_mode = #tpu.pipeline_mode<synchronous>, transform_indices = @transform_1, window_bounds = array<i64: 4, 16>}, {pipeline_mode = #tpu.pipeline_mode<synchronous>, transform_indices = @transform_2, window_bounds = array<i64: 1, 16>}, {pipeline_mode = #tpu.pipeline_mode<synchronous>, transform_indices = @transform_3, window_bounds = array<i64: 1, 16>}, {pipeline_mode = #tpu.pipeline_mode<synchronous>, transform_indices = @transform_4, window_bounds = array<i64: 16, 43>}, {pipeline_mode = #tpu.pipeline_mode<synchronous>, transform_indices = @transform_5, window_bounds = array<i64: 1, 43>}, {pipeline_mode = #tpu.pipeline_mode<synchronous>, transform_indices = @transform_6, window_bounds = array<i64: 2, 43>}]} {
    %c0_i32 = arith.constant 0 : i32
    %0 = arith.cmpi eq, %arg0, %c0_i32 : i32
    %1 = arith.extui %0 : i1 to i32
    %c0_i32_0 = arith.constant 0 : i32
    %2 = arith.cmpi ne, %1, %c0_i32_0 : i32
    scf.if %2 {
      %cst_9 = arith.constant 0.000000e+00 : f32
      %11 = vector.broadcast %cst_9 : f32 to vector<2x4xf32>
      %c0_10 = arith.constant 0 : index
      %c0_11 = arith.constant 0 : index
      %12 = vector.load %arg8[%c0_10, %c0_11] : memref<2x4xf32, #tpu.memory_space<vmem>>, vector<2x4xf32>
      tpu.vector_store %arg8[%c0_10, %c0_11], %11 {strides = array<i32>} : memref<2x4xf32, #tpu.memory_space<vmem>>, vector<2x4xf32>,
    } else {
    }
    %c0 = arith.constant 0 : index
    %c0_1 = arith.constant 0 : index
    %c0_2 = arith.constant 0 : index
    %3 = vector.load %arg1[%c0, %c0_1, %c0_2] : memref<2x4x4096xf32, #tpu.memory_space<vmem>>, vector<2x4x4096xf32>
    %c0_3 = arith.constant 0 : index
    %c0_4 = arith.constant 0 : index
    %4 = vector.load %arg8[%c0_3, %c0_4] : memref<2x4xf32, #tpu.memory_space<vmem>>, vector<2x4xf32>
    %cst = arith.constant dense<0.000000e+00> : vector<2x4xf32>
    %5 = vector.multi_reduction <add>, %3, %cst [2] : vector<2x4x4096xf32> to vector<2x4xf32>
    %6 = arith.addf %4, %5 : vector<2x4xf32>
    %c0_5 = arith.constant 0 : index
    %c0_6 = arith.constant 0 : index
    %7 = vector.load %arg8[%c0_5, %c0_6] : memref<2x4xf32, #tpu.memory_space<vmem>>, vector<2x4xf32>
    tpu.vector_store %arg8[%c0_5, %c0_6], %6 {strides = array<i32>} : memref<2x4xf32, #tpu.memory_space<vmem>>, vector<2x4xf32>,
    %c0_i32_7 = arith.constant 0 : i32
    %8 = arith.cmpi eq, %arg0, %c0_i32_7 : i32
    %9 = arith.extui %8 : i1 to i32
    %c0_i32_8 = arith.constant 0 : i32
    %10 = arith.cmpi ne, %9, %c0_i32_8 : i32
    scf.if %10 {
      %c0_9 = arith.constant 0 : index
      %c0_10 = arith.constant 0 : index
      %11 = vector.load %arg8[%c0_9, %c0_10] : memref<2x4xf32, #tpu.memory_space<vmem>>, vector<2x4xf32>
      %cst_11 = arith.constant 2.44140625E-4 : f32
      %12 = vector.broadcast %cst_11 : f32 to vector<2x4xf32>
      %13 = arith.mulf %11, %12 : vector<2x4xf32>
      %c0_12 = arith.constant 0 : index
      %c0_13 = arith.constant 0 : index
      %14 = vector.load %arg2[%c0_12, %c0_13] : memref<4x16xf32, #tpu.memory_space<vmem>>, vector<4x16xf32>
      %cst_14 = arith.constant dense<0.000000e+00> : vector<2x16xf32>
      %15 = tpu.matmul %13, %14, %cst_14 {dimension_numbers = #tpu.dot_dimension_numbers<[1], [0], [0], [1], [0, 0, 1, 1], [], []>} : vector<2x4xf32>, vector<4x16xf32>, vector<2x16xf32> -> vector<2x16xf32>
      %cst_15 = arith.constant dense<0.000000e+00> : vector<16xf32>
      %16 = vector.multi_reduction <add>, %15, %cst_15 [0] : vector<2x16xf32> to vector<16xf32>
      %17 = vector.shape_cast %16 : vector<16xf32> to vector<1x16xf32>
      %cst_16 = arith.constant 2.000000e+00 : f32
      %18 = vector.broadcast %cst_16 : f32 to vector<1x16xf32>
      %19 = arith.divf %17, %18 : vector<1x16xf32>
      %20 = vector.broadcast %19 : vector<1x16xf32> to vector<2x16xf32>
      %21 = arith.subf %15, %20 : vector<2x16xf32>
      %22 = arith.mulf %21, %21 : vector<2x16xf32>
      %cst_17 = arith.constant dense<0.000000e+00> : vector<16xf32>
      %23 = vector.multi_reduction <add>, %22, %cst_17 [0] : vector<2x16xf32> to vector<16xf32>
      %24 = vector.shape_cast %23 : vector<16xf32> to vector<1x16xf32>
      %cst_18 = arith.constant 2.000000e+00 : f32
      %25 = vector.broadcast %cst_18 : f32 to vector<1x16xf32>
      %26 = arith.divf %24, %25 : vector<1x16xf32>
      %27 = vector.broadcast %19 : vector<1x16xf32> to vector<2x16xf32>
      %28 = arith.subf %15, %27 : vector<2x16xf32>
      %cst_19 = arith.constant 9.99999974E-6 : f32
      %29 = vector.broadcast %cst_19 : f32 to vector<1x16xf32>
      %30 = arith.addf %26, %29 : vector<1x16xf32>
      %31 = math.rsqrt %30 : vector<1x16xf32>
      %32 = vector.broadcast %31 : vector<1x16xf32> to vector<2x16xf32>
      %33 = arith.mulf %28, %32 : vector<2x16xf32>
      %c0_20 = arith.constant 0 : index
      %c0_21 = arith.constant 0 : index
      %34 = vector.load %arg3[%c0_20, %c0_21] : memref<1x16xf32, #tpu.memory_space<vmem>>, vector<1x16xf32>
      %35 = vector.broadcast %34 : vector<1x16xf32> to vector<2x16xf32>
      %36 = arith.mulf %33, %35 : vector<2x16xf32>
      %c0_22 = arith.constant 0 : index
      %c0_23 = arith.constant 0 : index
      %37 = vector.load %arg4[%c0_22, %c0_23] : memref<1x16xf32, #tpu.memory_space<vmem>>, vector<1x16xf32>
      %38 = vector.broadcast %37 : vector<1x16xf32> to vector<2x16xf32>
      %39 = arith.addf %36, %38 : vector<2x16xf32>
      %cst_24 = arith.constant 0.000000e+00 : f32
      %40 = vector.broadcast %cst_24 : f32 to vector<2x16xf32>
      %41 = arith.maximumf %39, %40 : vector<2x16xf32>
      %c0_25 = arith.constant 0 : index
      %c0_26 = arith.constant 0 : index
      %42 = vector.load %arg5[%c0_25, %c0_26] : memref<16x43xf32, #tpu.memory_space<vmem>>, vector<16x43xf32>
      %cst_27 = arith.constant dense<0.000000e+00> : vector<2x43xf32>
      %43 = tpu.matmul %41, %42, %cst_27 {dimension_numbers = #tpu.dot_dimension_numbers<[1], [0], [0], [1], [0, 0, 1, 1], [], []>} : vector<2x16xf32>, vector<16x43xf32>, vector<2x43xf32> -> vector<2x43xf32>
      %c0_28 = arith.constant 0 : index
      %c0_29 = arith.constant 0 : index
      %44 = vector.load %arg6[%c0_28, %c0_29] : memref<1x43xf32, #tpu.memory_space<vmem>>, vector<1x43xf32>
      %45 = vector.broadcast %44 : vector<1x43xf32> to vector<2x43xf32>
      %46 = arith.addf %43, %45 : vector<2x43xf32>
      %47 = tpu.iota {dimensions = array<i32: 1>} : vector<2x43xi32>
      %c39_i32 = arith.constant 39 : i32
      %48 = vector.broadcast %c39_i32 : i32 to vector<2x43xi32>
      %49 = arith.cmpi sge, %47, %48 : vector<2x43xi32>
      %cst_30 = arith.constant 0xFF800000 : f32
      %50 = vector.broadcast %cst_30 : f32 to vector<2x43xf32>
      %51 = arith.select %49, %46, %50 : vector<2x43xi1>, vector<2x43xf32>
      %cst_31 = arith.constant dense<0xFF800000> : vector<2xf32>
      %52 = vector.multi_reduction <maximumf>, %51, %cst_31 [1] : vector<2x43xf32> to vector<2xf32>
      %53 = vector.shape_cast %52 : vector<2xf32> to vector<2x1xf32>
      %54 = vector.broadcast %53 : vector<2x1xf32> to vector<2x43xf32>
      %55 = arith.subf %51, %54 : vector<2x43xf32>
      %56 = math.exp %55 : vector<2x43xf32>
      %cst_32 = arith.constant dense<0.000000e+00> : vector<2xf32>
      %57 = vector.multi_reduction <add>, %56, %cst_32 [1] : vector<2x43xf32> to vector<2xf32>
      %58 = vector.shape_cast %57 : vector<2xf32> to vector<2x1xf32>
      %59 = tpu.reciprocal %58 {approx = true} : vector<2x1xf32> -> vector<2x1xf32>
      %60 = vector.broadcast %59 : vector<2x1xf32> to vector<2x43xf32>
      %61 = arith.mulf %56, %60 : vector<2x43xf32>
      %62 = arith.negf %46 : vector<2x43xf32>
      %63 = math.exp %62 : vector<2x43xf32>
      %cst_33 = arith.constant 1.000000e+00 : f32
      %64 = vector.broadcast %cst_33 : f32 to vector<2x43xf32>
      %65 = arith.addf %64, %63 : vector<2x43xf32>
      %66 = arith.divf %64, %65 : vector<2x43xf32>
      %67 = arith.select %49, %61, %66 : vector<2x43xi1>, vector<2x43xf32>
      %c0_34 = arith.constant 0 : index
      %c0_35 = arith.constant 0 : index
      %68 = vector.load %arg7[%c0_34, %c0_35] : memref<2x43xf32, #tpu.memory_space<vmem>>, vector<2x43xf32>
      tpu.vector_store %arg7[%c0_34, %c0_35], %67 {strides = array<i32>} : memref<2x43xf32, #tpu.memory_space<vmem>>, vector<2x43xf32>,
    } else {
    }
    return
  }
  func.func @transform_0(%arg0: i32) -> (i32, i32, i32) {
    %c0_i32 = arith.constant 0 : i32
    %c0_i32_0 = arith.constant 0 : i32
    %c0_i32_1 = arith.constant 0 : i32
    return %c0_i32, %c0_i32_0, %arg0 : i32, i32, i32
  }
  func.func @transform_1(%arg0: i32) -> (i32, i32) {
    %c0_i32 = arith.constant 0 : i32
    %c0_i32_0 = arith.constant 0 : i32
    %c0_i32_1 = arith.constant 0 : i32
    return %c0_i32, %c0_i32_0 : i32, i32
  }
  func.func @transform_2(%arg0: i32) -> (i32, i32) {
    %c0_i32 = arith.constant 0 : i32
    %c0_i32_0 = arith.constant 0 : i32
    %c0_i32_1 = arith.constant 0 : i32
    return %c0_i32, %c0_i32_0 : i32, i32
  }
  func.func @transform_3(%arg0: i32) -> (i32, i32) {
    %c0_i32 = arith.constant 0 : i32
    %c0_i32_0 = arith.constant 0 : i32
    %c0_i32_1 = arith.constant 0 : i32
    return %c0_i32, %c0_i32_0 : i32, i32
  }
  func.func @transform_4(%arg0: i32) -> (i32, i32) {
    %c0_i32 = arith.constant 0 : i32
    %c0_i32_0 = arith.constant 0 : i32
    %c0_i32_1 = arith.constant 0 : i32
    return %c0_i32, %c0_i32_0 : i32, i32
  }
  func.func @transform_5(%arg0: i32) -> (i32, i32) {
    %c0_i32 = arith.constant 0 : i32
    %c0_i32_0 = arith.constant 0 : i32
    %c0_i32_1 = arith.constant 0 : i32
    return %c0_i32, %c0_i32_0 : i32, i32
  }
  func.func @transform_6(%arg0: i32) -> (i32, i32) {
    %c0_i32 = arith.constant 0 : i32
    %c0_i32_0 = arith.constant 0 : i32
    %c0_i32_1 = arith.constant 0 : i32
    return %c0_i32, %c0_i32_0 : i32, i32
  }
}

</mosaic_0001>

<bundles_post_ra>
// kernel: attention3d_forward.1
= control target key start
LH: loop header
LB: loop body
LE: loop exit
PB: predicated region body
PF: predicated region fallthrough
CT: control target
= control target key end

     0   :  { %vm158_vm0 = vcmask 1043456   ;;  %vm27_vm1 = vcmask 25600   ;;  %vm612_vm2 = vmmov 0   ;;  %vm301_vm3 = vcmask 1041409   ;;  %s844_s0 = inlined_call_operand.vmem [shape: f32[2,4,4096], index: 0, kind: input, shape index: {}]   ;;  %s845_s1 = inlined_call_operand.vmem [shape: f32[4,16], index: 1, kind: input, shape index: {}]   ;;  %s846_s4 = inlined_call_operand.vmem [shape: f32[16,43], index: 4, kind: input, shape index: {}]   ;;  %s847_s2 = inlined_call_operand.vmem [shape: f32[1,16], index: 2, kind: input, shape index: {}]   ;;  %s848_s3 = inlined_call_operand.vmem [shape: f32[1,16], index: 3, kind: input, shape index: {}]   ;;  %s849_s5 = inlined_call_operand.vmem [shape: f32[1,43], index: 5, kind: input, shape index: {}]   ;;  %s850_s6 = inlined_call_operand.vmem [shape: f32[2,43], index: 6, kind: output, shape index: {}]  }
   0x1   :  { %v29_v0 = vld [vmem:[%s844_s0] sm:$0xff]  ;;  %v30_v1 = vld [vmem:[%s844_s0 + $0x8] sm:$0xff]  ;;  %v31_v5 = vld [vmem:[%s844_s0 + $0x10] sm:$0xff]  ;;  %vm313_vm4 = vcmask 31744   ;;  %vm390_vm5 = vcmask 123904   ;;  %vm439_vm6 = vcmask 130048  }
   0x2   :  { %v94_v2 = vcombine.high %v29_v0, %v29_v0  ;;  %v95_v3 = vcombine.high %v30_v1, %v30_v1  ;;  %v159_v4 = vsel %vm158_vm0, %v29_v0, 0.0  ;;  %v162_v7 = vsel %vm158_vm0, %v30_v1, 0.0  ;;  %v32_v11 = vld [vmem:[%s844_s0 + $0x18] sm:$0xff]  ;;  %v33_v17 = vld [vmem:[%s844_s0 + $0x20] sm:$0xff]  ;;  %v34_v24 = vld [vmem:[%s844_s0 + $0x28] sm:$0xff] }
   0x3   :  { %v96_v9 = vcombine.high %v31_v5, %v31_v5  ;;  %v166_v13 = vsel %vm158_vm0, %v31_v5, 0.0  ;;  %v97_v15 = vcombine.high %v32_v11, %v32_v11  ;;  %v170_v19 = vsel %vm158_vm0, %v32_v11, 0.0  ;;  %v45_v21 = vld [vmem:[%s844_s0 + $0x80] sm:$0xff]  ;;  %v46_v26 = vld [vmem:[%s844_s0 + $0x88] sm:$0xff]  ;;  %v35_v33 = vld [vmem:[%s844_s0 + $0x30] sm:$0xff] }
   0x4   :  { %v160_v6 = vsel %vm158_vm0, %v94_v2, 0.0  ;;  %v164_v10 = vsel %vm158_vm0, %v95_v3, 0.0  ;;  %v98_v22 = vcombine.high %v33_v17, %v33_v17  ;;  %v174_v27 = vsel %vm158_vm0, %v33_v17, 0.0  ;;  %v47_v35 = vld [vmem:[%s844_s0 + $0x90] sm:$0xff]  ;;  %v36_v46 = vld [vmem:[%s844_s0 + $0x38] sm:$0xff]  ;;  %v37_v58 = vld [vmem:[%s844_s0 + $0x40] sm:$0xff] }
   0x5   :  { %v161_v8 = vadd.f32 %v160_v6, %v159_v4  ;;  %v168_v16 = vsel %vm158_vm0, %v96_v9, 0.0  ;;  %v172_v23 = vsel %vm158_vm0, %v97_v15, 0.0  ;;  %v110_v28 = vcombine.high %v45_v21, %v45_v21  ;;  %v48_v48 = vld [vmem:[%s844_s0 + $0x98] sm:$0xff]  ;;  %v49_v60 = vld [vmem:[%s844_s0 + $0xa0] sm:$0xff]  ;;  %v38_v6 = vld [vmem:[%s844_s0 + $0x48] sm:$0xff] }
   0x6   :  { %v99_v30 = vcombine.high %v34_v24, %v34_v24  ;;  %v176_v31 = vsel %vm158_vm0, %v98_v22, 0.0  ;;  %v111_v32 = vcombine.high %v46_v26, %v46_v26  ;;  %v178_v36 = vsel %vm158_vm0, %v34_v24, 0.0 }
   0x7   :  { %v163_v12 = vadd.f32 %v162_v7, %v161_v8  ;;  %v224_v37 = vsel %vm158_vm0, %v45_v21, 0.0  ;;  %v225_v38 = vsel %vm158_vm0, %v110_v28, 0.0  ;;  %v227_v39 = vsel %vm158_vm0, %v46_v26, 0.0  ;;  %v50_v8 = vld [vmem:[%s844_s0 + $0xa8] sm:$0xff] }
   0x8   :  { %v226_v41 = vadd.f32 %v225_v38, %v224_v37  ;;  %v100_v42 = vcombine.high %v35_v33, %v35_v33  ;;  %v180_v43 = vsel %vm158_vm0, %v99_v30, 0.0  ;;  %v112_v44 = vcombine.high %v47_v35, %v47_v35  ;;  %v40_v30 = vld [vmem:[%s844_s0 + $0x58] sm:$0xff] }
   0x9   :  { %v165_v14 = vadd.f32 %v164_v10, %v163_v12  ;;  %v229_v45 = vsel %vm158_vm0, %v111_v32, 0.0  ;;  %v182_v50 = vsel %vm158_vm0, %v35_v33, 0.0  ;;  %v231_v51 = vsel %vm158_vm0, %v47_v35, 0.0  ;;  %v52_v32 = vld [vmem:[%s844_s0 + $0xb8] sm:$0xff] }
   0xa   :  { %v228_v49 = vadd.f32 %v227_v39, %v226_v41  ;;  %v101_v54 = vcombine.high %v36_v46, %v36_v46  ;;  %v184_v55 = vsel %vm158_vm0, %v100_v42, 0.0  ;;  %v113_v56 = vcombine.high %v48_v48, %v48_v48  ;;  %v41_v42 = vld [vmem:[%s844_s0 + $0x60] sm:$0xff] }
   0xb   :  { %v167_v18 = vadd.f32 %v166_v13, %v165_v14  ;;  %v233_v57 = vsel %vm158_vm0, %v112_v44, 0.0  ;;  %v186_v62 = vsel %vm158_vm0, %v36_v46, 0.0  ;;  %v235_v63 = vsel %vm158_vm0, %v48_v48, 0.0  ;;  %v53_v44 = vld [vmem:[%s844_s0 + $0xc0] sm:$0xff] }
   0xc   :  { %v230_v53 = vadd.f32 %v229_v45, %v228_v49  ;;  %v102_v2 = vcombine.high %v37_v58, %v37_v58  ;;  %v188_v3 = vsel %vm158_vm0, %v101_v54, 0.0  ;;  %v114_v4 = vcombine.high %v49_v60, %v49_v60  ;;  %v42_v54 = vld [vmem:[%s844_s0 + $0x68] sm:$0xff] }
   0xd   :  { %v169_v20 = vadd.f32 %v168_v16, %v167_v18  ;;  %v237_v5 = vsel %vm158_vm0, %v113_v56, 0.0  ;;  %v190_v10 = vsel %vm158_vm0, %v37_v58, 0.0  ;;  %v239_v11 = vsel %vm158_vm0, %v49_v60, 0.0  ;;  %v39_v18 = vld [vmem:[%s844_s0 + $0x50] sm:$0xff]  ;;  %v54_v56 = vld [vmem:[%s844_s0 + $0xc8] sm:$0xff] }
   0xe   :  { %v232_v61 = vadd.f32 %v231_v51, %v230_v53  ;;  %v103_v14 = vcombine.high %v38_v6, %v38_v6  ;;  %v192_v15 = vsel %vm158_vm0, %v102_v2, 0.0  ;;  %v115_v16 = vcombine.high %v50_v8, %v50_v8  ;;  %v43_v2 = vld [vmem:[%s844_s0 + $0x70] sm:$0xff] }
   0xf   :  { %v171_v25 = vadd.f32 %v170_v19, %v169_v20  ;;  %v241_v17 = vsel %vm158_vm0, %v114_v4, 0.0  ;;  %v51_v20 = vld [vmem:[%s844_s0 + $0xb0] sm:$0xff]  ;;  %v194_v22 = vsel %vm158_vm0, %v38_v6, 0.0  ;;  %v104_v26 = vcombine.high %v39_v18, %v39_v18 }
  0x10   :  { %v234_v1 = vadd.f32 %v233_v57, %v232_v61  ;;  %v116_v28 = vcombine.high %v51_v20, %v51_v20  ;;  %v247_v35 = vsel %vm158_vm0, %v51_v20, 0.0  ;;  %v105_v38 = vcombine.high %v40_v30, %v40_v30  ;;  %v55_v4 = vld [vmem:[%s844_s0 + $0xd0] sm:$0xff] }
  0x11   :  { %v173_v29 = vadd.f32 %v172_v23, %v171_v25  ;;  %v243_v23 = vsel %vm158_vm0, %v50_v8, 0.0  ;;  %v200_v39 = vsel %vm158_vm0, %v104_v26, 0.0  ;;  %v202_v46 = vsel %vm158_vm0, %v40_v30, 0.0 }
  0x12   :  { %v236_v9 = vadd.f32 %v235_v63, %v234_v1  ;;  %v249_v41 = vsel %vm158_vm0, %v116_v28, 0.0  ;;  %v204_v51 = vsel %vm158_vm0, %v105_v38, 0.0  ;;  %v206_v58 = vsel %vm158_vm0, %v41_v42, 0.0 }
  0x13   :  { %v175_v34 = vadd.f32 %v174_v27, %v173_v29  ;;  %v196_v27 = vsel %vm158_vm0, %v103_v14, 0.0  ;;  %v245_v29 = vsel %vm158_vm0, %v115_v16, 0.0  ;;  %v210_v6 = vsel %vm158_vm0, %v42_v54, 0.0  ;;  %v44_v14 = vld [vmem:[%s844_s0 + $0x78] sm:$0xff] }
  0x14   :  { %v238_v13 = vadd.f32 %v237_v5, %v236_v9  ;;  %v56_v16 = vld [vmem:[%s844_s0 + $0xd8] sm:$0xff]  ;;  %vm515_vm8 = vcmask 345088  }
  0x15   :  { %v177_v40 = vadd.f32 %v176_v31, %v175_v34  ;;  %v198_v34 = vsel %vm158_vm0, %v39_v18, 0.0  ;;  %v214_v18 = vsel %vm158_vm0, %v43_v2, 0.0  ;;  %v267_v30 = vsel %vm158_vm0, %v56_v16, 0.0 }
  0x16   :  { %v240_v21 = vadd.f32 %v239_v11, %v238_v13 }
  0x17   :  { %v179_v47 = vadd.f32 %v178_v36, %v177_v40  ;;  %v117_v40 = vcombine.high %v52_v32, %v52_v32 }
  0x18   :  { %v242_v25 = vadd.f32 %v241_v17, %v240_v21 }
  0x19   :  { %v181_v52 = vadd.f32 %v180_v43, %v179_v47  ;;  %v251_v47 = vsel %vm158_vm0, %v52_v32, 0.0  ;;  %v253_v53 = vsel %vm158_vm0, %v117_v40, 0.0 }
  0x1a   :  { %v244_v33 = vadd.f32 %v243_v23, %v242_v25 }
  0x1b   :  { %v183_v59 = vadd.f32 %v182_v50, %v181_v52  ;;  %v106_v50 = vcombine.high %v41_v42, %v41_v42  ;;  %v118_v52 = vcombine.high %v53_v44, %v53_v44 }
  0x1c   :  { %v246_v37 = vadd.f32 %v245_v29, %v244_v33  ;;  %v218_v29 = vsel %vm158_vm0, %v44_v14, 0.0 }
  0x1d   :  { %v185_v0 = vadd.f32 %v184_v55, %v183_v59  ;;  %v255_v59 = vsel %vm158_vm0, %v53_v44, 0.0  ;;  %v208_v63 = vsel %vm158_vm0, %v106_v50, 0.0  ;;  %v257_v1 = vsel %vm158_vm0, %v118_v52, 0.0  ;;  %v59_v44 = vld [vmem:[%s844_s0 + $0xf0] sm:$0xff]  ;;  %v60_v50 = vld [vmem:[%s844_s0 + $0xf8] sm:$0xff] }
  0x1e   :  { %v248_v45 = vadd.f32 %v247_v35, %v246_v37  ;;  %v58_v37 = vld [vmem:[%s844_s0 + $0xe8] sm:$0xff]  ;;  %v279_v52 = vsel %vm158_vm0, %v59_v44, 0.0 }
  0x1f   :  { %v187_v7 = vadd.f32 %v186_v62, %v185_v0  ;;  %v107_v62 = vcombine.high %v42_v54, %v42_v54  ;;  %v119_v0 = vcombine.high %v54_v56, %v54_v56  ;;  %v123_v42 = vcombine.high %v58_v37, %v58_v37 }
  0x20   :  { %v250_v49 = vadd.f32 %v249_v41, %v248_v45  ;;  %v125_v54 = vcombine.high %v60_v50, %v60_v50 }
  0x21   :  { %v189_v12 = vadd.f32 %v188_v3, %v187_v7  ;;  %v259_v7 = vsel %vm158_vm0, %v54_v56, 0.0  ;;  %v212_v11 = vsel %vm158_vm0, %v107_v62, 0.0  ;;  %v261_v13 = vsel %vm158_vm0, %v119_v0, 0.0 }
  0x22   :  { %v252_v57 = vadd.f32 %v251_v47, %v250_v49  ;;  %v277_v49 = vsel %vm158_vm0, %v123_v42, 0.0  ;;  %v611_v62 = vmov 0.0   ;;  %v291_v0 = vlaneseq }
  0x23   :  { %v191_v19 = vadd.f32 %v190_v10, %v189_v12  ;;  %v108_v10 = vcombine.high %v43_v2, %v43_v2  ;;  %v120_v12 = vcombine.high %v55_v4, %v55_v4  ;;  %28 = vst.msk [vmem:[#allocation2] sm:$0x3] %vm27_vm1, %v611_v62  ;;  %551 = vmatprep.subr.mxu0 %v611_v62 }
  0x24   :  { %v254_v61 = vadd.f32 %v253_v53, %v252_v57  ;;  %v283_v57 = vsel %vm158_vm0, %v60_v50, 0.0  ;;  %553 = vmatprep.mubr.msk.f32.mxu0 %vm612_vm2, %v611_v62  ;;  %560 = vmatprep.mubr.msk.f32.mxu1 %vm612_vm2, %v611_v62  ;;  %v294_v2 = vshrl.u32 %v291_v0, 7 }
  0x25   :  { %v193_v24 = vadd.f32 %v192_v15, %v191_v19  ;;  %v263_v19 = vsel %vm158_vm0, %v55_v4, 0.0  ;;  %v216_v23 = vsel %vm158_vm0, %v108_v10, 0.0  ;;  %v265_v25 = vsel %vm158_vm0, %v120_v12, 0.0 }
  0x26   :  { %v256_v5 = vadd.f32 %v255_v59, %v254_v61  ;;  %v285_v59 = vsel %vm158_vm0, %v125_v54, 0.0 }
  0x27   :  { %v195_v31 = vadd.f32 %v194_v22, %v193_v24  ;;  %v109_v22 = vcombine.high %v44_v14, %v44_v14  ;;  %v121_v24 = vcombine.high %v56_v16, %v56_v16  ;;  %v431_v14 = vld [vmem:[%s846_s4 + $0x8] sm:$0xff]  ;;  %v613_v16 = vmov 0.0|0.0  }
  0x28   :  { %v258_v9 = vadd.f32 %v257_v1, %v256_v5  ;;  %v814_v1 = vand.u32 127, %v291_v0  ;;  %563 = vmatprep.subr.bf16.mxu1 %v613_v16 }
  0x29   :  { %v197_v36 = vadd.f32 %v196_v27, %v195_v31  ;;  %v57_v27 = vld [vmem:[%s844_s0 + $0xe0] sm:$0xff]  ;;  %v220_v33 = vsel %vm158_vm0, %v109_v22, 0.0  ;;  %v269_v35 = vsel %vm158_vm0, %v121_v24, 0.0 }
  0x2a   :  { %v260_v17 = vadd.f32 %v259_v7, %v258_v9  ;;  %v295_v4 = vsub.s32 %v814_v1, %v294_v2  ;;  %vm513_vm7 = vcmp.ge.s32.totalorder %v814_v1, 39 }
  0x2b   :  { %v199_v43 = vadd.f32 %v198_v34, %v197_v36  ;;  %v122_v34 = vcombine.high %v57_v27, %v57_v27 }
  0x2c   :  { %v262_v21 = vadd.f32 %v261_v13, %v260_v17  ;;  %v430_v13 = vld [vmem:[%s846_s4] sm:$0xff] }
  0x2d   :  { %v201_v48 = vadd.f32 %v200_v39, %v199_v43  ;;  %v271_v39 = vsel %vm158_vm0, %v57_v27, 0.0  ;;  %v273_v43 = vsel %vm158_vm0, %v122_v34, 0.0 }
  0x2e   :  { %v264_v28 = vadd.f32 %v263_v19, %v262_v21 }
  0x2f   :  { %v203_v55 = vadd.f32 %v202_v46, %v201_v48  ;;  %v275_v46 = vsel %vm158_vm0, %v58_v37, 0.0  ;;  %v124_v48 = vcombine.high %v59_v44, %v59_v44 }
  0x30   :  { %v266_v32 = vadd.f32 %v265_v25, %v264_v28 }
  0x31   :  { %v205_v60 = vadd.f32 %v204_v51, %v203_v55  ;;  %v281_v55 = vsel %vm158_vm0, %v124_v48, 0.0 }
  0x32   :  { %v268_v38 = vadd.f32 %v267_v30, %v266_v32 }
  0x33   :  { %v207_v3 = vadd.f32 %v206_v58, %v205_v60 }
  0x34   :  { %v270_v41 = vadd.f32 %v269_v35, %v268_v38 }
  0x35   :  { %v209_v8 = vadd.f32 %v208_v63, %v207_v3  ;;  %v312_v63 = vld [vmem:[%s845_s1] sm:$0xf] }
  0x36   :  { %v272_v45 = vadd.f32 %v271_v39, %v270_v41  ;;  %552 = vmatpush3.msk.msra.mxu0 %vm158_vm0, %v312_v63  ;;  %v541_v39 = vld [vmem:[%s847_s2] ss:$0 sm:$0xff] }
  0x37   :  { %v211_v15 = vadd.f32 %v210_v6, %v209_v8  ;;  %v61_v8 = vld [vmem:[#allocation2] sm:$0x3] }
  0x38   :  { %v274_v47 = vadd.f32 %v273_v43, %v272_v45  ;;  %v542_v41 = vld [vmem:[%s848_s3] ss:$0 sm:$0xff] }
  0x39   :  { %v213_v20 = vadd.f32 %v212_v11, %v211_v15  ;;  %v564_v15 = vpack.c.bf16 %v431_v14, %v430_v13  ;;  %v543_v45 = vld [vmem:[%s849_s5] ss:$0 sm:$0xff] }
  0x3a   :  { %v276_v51 = vadd.f32 %v275_v46, %v274_v47 }
  0x3b   :  { %v215_v26 = vadd.f32 %v214_v18, %v213_v20  ;;  %565 = vmatpush3.bf16.msra.mxu1 %v564_v15 }
  0x3c   :  { %v278_v53 = vadd.f32 %v277_v49, %v276_v51 }
  0x3d   :  { %v217_v31 = vadd.f32 %v216_v23, %v215_v26 }
  0x3e   :  { %v280_v56 = vadd.f32 %v279_v52, %v278_v53 }
  0x3f   :  { %v219_v36 = vadd.f32 %v218_v29, %v217_v31 }
  0x40   :  { %v282_v58 = vadd.f32 %v281_v55, %v280_v56 }
  0x41   :  { %v221_v40 = vadd.f32 %v220_v33, %v219_v36 }
  0x42   :  { %v284_v60 = vadd.f32 %v283_v57, %v282_v58 }
  0x43   :  { %222 = vadd.xlane.f32.xlu0 %v221_v40 }
  0x44   :  { %v286_v61 = vadd.f32 %v285_v59, %v284_v60 }
  0x47   :  { %287 = vadd.xlane.f32.xlu0 %v286_v61 }
  0xd0   :  { %v223_v3 = vpop.xlane.xlu0 %222 }
  0xd1   :  { %v296_v6 = vrot.slane %v223_v3, %v295_v4 }
  0xd4   :  { %v288_v5 = vpop.xlane.xlu0 %287 }
  0xd5   :  { %v300_v7 = vrot.slane %v288_v5, %v295_v4 }
  0xd7   :  { %v302_v9 = vsel %vm301_vm3, %v300_v7, %v296_v6 }
  0xd8   :  { %v304_v10 = vadd.f32 %v302_v9, %v61_v8 }
  0xda   :  { %306 = vst.msk [vmem:[#allocation2] sm:$0x3] %vm27_vm1, %v304_v10 }
  0xe1   :  { %v310_v11 = vld [vmem:[#allocation2] sm:$0x3] }
  0xe2   :  { %v311_v12 = vmul.f32 0.00024414063, %v310_v11 }
  0xe4   :  { %554 = vmatmul.mubr.msk.f32.vlgmr.msra.gmra.mrb[0].mxu0 %vm313_vm4, %v311_v12 }
 0x1b7   :  { %v386_v17 = vpop.f32.mrb[0].mxu0 }
 0x1b8   :  { %v391_v18 = vsel %vm390_vm5, %v386_v17, 0.0  ;;  %v555_v19 = vpop.f32.mrb[1].mxu0 }
 0x1b9   :  { %v392_v20 = vrot.slane %v391_v18, 4 }
 0x1bb   :  { %v393_v21 = vadd.f32 %v392_v20, %v391_v18 }
 0x1bd   :  { %v394_v22 = vrot.slane %v393_v21, 2 }
 0x1bf   :  { %v395_v23 = vadd.f32 %v394_v22, %v393_v21 }
 0x1c1   :  { %v396_v24 = vrot.slane %v395_v23, 1 }
 0x1c3   :  { %v397_v25 = vadd.f32 %v396_v24, %v395_v23 }
 0x1c5   :  { %v399_v26 = vmul.f32 0.5, %v397_v25 }
 0x1c7   :  { %v400_v27 = vsub.f32 %v386_v17, %v399_v26 }
 0x1c9   :  { %v401_v28 = vmul.f32 %v400_v27, %v400_v27 }
 0x1cb   :  { %v402_v29 = vsel %vm390_vm5, %v401_v28, 0.0 }
 0x1cc   :  { %v403_v30 = vrot.slane %v402_v29, 4 }
 0x1ce   :  { %v404_v31 = vadd.f32 %v403_v30, %v402_v29 }
 0x1d0   :  { %v405_v32 = vrot.slane %v404_v31, 2 }
 0x1d2   :  { %v406_v33 = vadd.f32 %v405_v32, %v404_v31 }
 0x1d4   :  { %v407_v34 = vrot.slane %v406_v33, 1 }
 0x1d6   :  { %v408_v35 = vadd.f32 %v407_v34, %v406_v33 }
 0x1d8   :  { %v409_v36 = vmul.f32 0.5, %v408_v35 }
 0x1da   :  { %v410_v37 = vadd.f32 1e-05, %v409_v36 }
 0x1dc   :  { %601 = vrsqrt.f32 %v410_v37 }
 0x1e6   :  { %v602_v38 = vpop.eup %601 }
 0x1e7   :  { %v412_v40 = vmul.f32 %v602_v38, %v400_v27 }
 0x1e9   :  { %v420_v42 = vmul.f32 %v541_v39, %v412_v40 }
 0x1eb   :  { %v428_v43 = vadd.f32 %v542_v41, %v420_v42 }
 0x1ed   :  { %v429_v44 = vmax.f32 %v428_v43, 0.0 }
 0x1ef   :  { %561 = vmatmul.mubr.msk.f32.vlgmr.msra.gmra.mrb[0].mxu1 %vm439_vm6, %v429_v44 }
 0x2c2   :  { %v509_v46 = vpop.f32.mrb[0].mxu1 }
 0x2c3   :  { %v510_v47 = vadd.f32 %v543_v45, %v509_v46  ;;  %v562_v48 = vpop.f32.mrb[1].mxu1 }
 0x2c5   :  { %v514_v49 = vsel %vm513_vm7, %v510_v47, -inf  ;;  %v545_v56 = vmul.f32 -1.442695, %v510_v47 }
 0x2c6   :  { %v516_v50 = vsel %vm515_vm8, %v514_v49, -inf }
 0x2c7   :  { %517 = vmax.xlane.f32.xlu1 %v516_v50 }
 0x354   :  { %v518_v51 = vpop.xlane.xlu1 %517 }
 0x355   :  { %v519_v52 = vsub.f32 %v514_v49, %v518_v51 }
 0x357   :  { %v520_v53 = vmul.f32 1.442695, %v519_v52 }
 0x359   :  { %603 = vpow2.f32 %v520_v53 }
 0x35a   :  { %605 = vpow2.f32 %v545_v56 }
 0x363   :  { %v604_v54 = vpop.eup %603 }
 0x364   :  { %v522_v55 = vsel %vm515_vm8, %v604_v54, 0.0  ;;  %v606_v57 = vpop.eup %605 }
 0x365   :  { %523 = vadd.xlane.f32.xlu1 %v522_v55  ;;  %v530_v58 = vadd.f32 1.0, %v606_v57 }
 0x3f2   :  { %v524_v59 = vpop.xlane.xlu1 %523 }
 0x3f3   :  { %607 = vrcp.f32 %v524_v59 }
 0x3f4   :  { %609 = vrcp.f32 %v530_v58 }
 0x3fd   :  { %v608_v60 = vpop.eup %607 }
 0x3fe   :  { %v526_v61 = vmul.f32 %v608_v60, %v604_v54  ;;  %v610_v62 = vpop.eup %609 }
 0x400   :  { %v533_v63 = vsel %vm513_vm7, %v526_v61, %v610_v62 }
 0x401   :  { %534 = vst.msk [vmem:[%s850_s6] sm:$0x3] %vm515_vm8, %v533_v63 }

</bundles_post_ra>
